<compile_context>
chip_gen: v7x
topology: tpu7x:2x2x1
jax: 0.10.0
libtpu: 0.0.40
codegen_flags: <defaults>
</compile_context>

<pallas_src>
import functools

import jax
import jax.numpy as jnp
from jax.experimental import pallas as pl
from jax.experimental.pallas import tpu as pltpu

LANE = 128
FUSED_MAX_ROWS = 4096   # whole-array fused path up to (4096, 128) f32 = 2 MiB
MAX_TILE_ROWS = 8192    # tiled path: up to (8192, 128) f32 = 4 MiB per block
VMEM_LIMIT = 40 << 20   # scoped VMEM; < v7x 64 MiB physical, plenty on v5e/v6e


def _round_up(a, b):
    return ((a + b - 1) // b) * b


# ----------------------------- fused path ----------------------------------
def _fused_quant_log_kernel(x_ref, o_ref, *, qmin, qmax):
    """Whole array resident in VMEM: log once, reduce max|log|, fake-quant."""
    y = jnp.log(x_ref[...].astype(jnp.float32))
    max_abs = jnp.max(jnp.abs(y))                       # pad=1.0 -> |log|=0, neutral
    step = jnp.where(max_abs > 0.0, max_abs / qmax, 1.0)
    inv_step = jnp.where(max_abs > 0.0, qmax / max_abs, 1.0)   # exact reciprocal
    q = jnp.clip(jnp.round(y * inv_step), qmin, qmax)          # round-half-to-even
    o_ref[...] = (q * step).astype(o_ref.dtype)


# ----------------------------- tiled path ----------------------------------
def _minmax_kernel(x_ref, min_ref, max_ref):
    """Per-block min/max of x as (8, LANE) slabs; pure VPU, no transcendentals."""
    x = x_ref[...].astype(jnp.float32)
    xr = x.reshape(-1, 8, LANE)                 # stays on (8,128) tile boundaries
    min_ref[...] = jnp.min(xr, axis=0)          # elementwise vreg min across tiles
    max_ref[...] = jnp.max(xr, axis=0)


def _quant_log_kernel(stat_ref, x_ref, o_ref, *, qmin, qmax):
    """Elementwise fake-quantized log(x); per-tensor scale from scalar prefetch."""
    max_abs = stat_ref[0]
    step = jnp.where(max_abs > 0.0, max_abs / qmax, 1.0)
    inv_step = jnp.where(max_abs > 0.0, qmax / max_abs, 1.0)  # exact reciprocal
    y = jnp.log(x_ref[...].astype(jnp.float32))
    q = jnp.clip(jnp.round(y * inv_step), qmin, qmax)
    o_ref[...] = (q * step).astype(o_ref.dtype)


def quant_log(x, bits=8):
    """QuantLog forward: fake-quantized log(x), per-tensor signed scale."""
    orig_shape = x.shape
    orig_dtype = x.dtype
    n = x.size
    itemsize = jnp.dtype(orig_dtype).itemsize

    # Quant range (signed, non-narrow): [-2^(b-1), 2^(b-1)-1].
    qmax = 2.0 ** (bits - 1) - 1.0
    qmin = -(2.0 ** (bits - 1))

    rows = pl.cdiv(n, LANE)

    # ------------------------- fused single-pass -----------------------------
    if rows <= FUSED_MAX_ROWS:
        flat = x.reshape(-1)
        pad = rows * LANE - n
        if pad:
            # pad with 1.0: log(1)=0 is neutral for max|log(x)|.
            flat = jnp.pad(flat, (0, pad), constant_values=1.0)
        x2d = flat.reshape(rows, LANE)

        out2d = pl.pallas_call(
            functools.partial(_fused_quant_log_kernel, qmin=qmin, qmax=qmax),
            out_shape=jax.ShapeDtypeStruct((rows, LANE), orig_dtype),
            in_specs=[pl.BlockSpec((rows, LANE), lambda: (0, 0))],
            out_specs=pl.BlockSpec((rows, LANE), lambda: (0, 0)),
            compiler_params=pltpu.CompilerParams(vmem_limit_bytes=VMEM_LIMIT),
            cost_estimate=pl.CostEstimate(
                flops=7 * n, transcendentals=n,
                bytes_accessed=2 * n * itemsize),
        )(x2d)

        out = out2d.reshape(-1)[:n] if pad else out2d.reshape(-1)
        return out.reshape(orig_shape)

    # ------------------------------ tiled path -------------------------------
    rows8 = _round_up(rows, 8)
    num_blocks = max(2, pl.cdiv(rows8, MAX_TILE_ROWS))
    if num_blocks % 2:
        num_blocks += 1                      # even block count: both v7x TCs busy
    tile_rows = _round_up(pl.cdiv(rows8, num_blocks), 8)
    rows_p = num_blocks * tile_rows
    grid = (num_blocks,)

    flat = x.reshape(-1)
    pad = rows_p * LANE - n
    if pad:
        # TODO(synk): masked tail block would avoid this padded copy + final
        # slice for unaligned sizes.  Pad value 1.0 is neutral here too: the
        # scale is max(log(max x), -log(min x)) >= 0, and log(1)=0 can't win.
        flat = jnp.pad(flat, (0, pad), constant_values=1.0)
    x2d = flat.reshape(rows_p, LANE)

    # ---- Pass 1: per-block min/max of x (no transcendentals, parallel). ----
    mins, maxs = pl.pallas_call(
        _minmax_kernel,
        out_shape=(jax.ShapeDtypeStruct((num_blocks * 8, LANE), jnp.float32),
                   jax.ShapeDtypeStruct((num_blocks * 8, LANE), jnp.float32)),
        grid_spec=pltpu.PrefetchScalarGridSpec(
            num_scalar_prefetch=0,
            grid=grid,
            in_specs=[pl.BlockSpec((tile_rows, LANE), lambda i: (i, 0))],
            out_specs=[pl.BlockSpec((8, LANE), lambda i: (i, 0)),
                       pl.BlockSpec((8, LANE), lambda i: (i, 0))],
        ),
        compiler_params=pltpu.CompilerParams(
            dimension_semantics=("parallel",),
            vmem_limit_bytes=VMEM_LIMIT),
        cost_estimate=pl.CostEstimate(
            flops=2 * n, transcendentals=0,
            bytes_accessed=n * itemsize + 2 * num_blocks * 8 * LANE * 4),
    )(x2d)

    gmin = jnp.min(mins)
    gmax = jnp.max(maxs)
    # max over elements of |log x| == max(log(max x), -log(min x))  (x > 0).
    max_abs = jnp.maximum(jnp.log(gmax), -jnp.log(gmin)).reshape(1).astype(jnp.float32)

    # ---- Pass 2: elementwise fake-quantized log (scale via scalar prefetch). ----
    out2d = pl.pallas_call(
        functools.partial(_quant_log_kernel, qmin=qmin, qmax=qmax),
        out_shape=jax.ShapeDtypeStruct((rows_p, LANE), orig_dtype),
        grid_spec=pltpu.PrefetchScalarGridSpec(
            num_scalar_prefetch=1,          # max_abs lands in SMEM
            grid=grid,
            in_specs=[pl.BlockSpec((tile_rows, LANE), lambda i, s: (i, 0))],
            out_specs=pl.BlockSpec((tile_rows, LANE), lambda i, s: (i, 0)),
        ),
        compiler_params=pltpu.CompilerParams(
            dimension_semantics=("parallel",),
            vmem_limit_bytes=VMEM_LIMIT),
        cost_estimate=pl.CostEstimate(
            flops=5 * n, transcendentals=n,
            bytes_accessed=2 * n * itemsize + 4),
    )(max_abs, x2d)

    if pad:
        return out2d.reshape(-1)[:n].reshape(orig_shape)
    return out2d.reshape(orig_shape)


def _reference(x, bits=8):
    """Pure-JAX reference of the same semantics (same exact-reciprocal formula)."""
    y = jnp.log(x)
    max_abs = jnp.max(jnp.abs(y))
    qmax = 2.0 ** (bits - 1) - 1.0
    qmin = -(2.0 ** (bits - 1))
    s = jnp.where(max_abs > 0, max_abs / qmax, 1.0)
    inv_s = jnp.where(max_abs > 0, qmax / max_abs, 1.0)
    return (jnp.clip(jnp.round(y * inv_s), qmin, qmax) * s).astype(x.dtype)


if __name__ == "__main__":
    key = jax.random.PRNGKey(0)

    # Small NCHW input, strictly positive (domain of log) -> fused path.
    x_small = jax.random.uniform(key, (2, 4, 16, 16), dtype=jnp.float32,
                                 minval=0.1, maxval=5.0)
    out_small = jax.block_until_ready(quant_log(x_small, bits=8))
    ref_small = _reference(x_small, bits=8)
    assert out_small.shape == x_small.shape and out_small.dtype == x_small.dtype
    assert jnp.allclose(out_small, ref_small, atol=1e-5, rtol=1e-5)

    # Larger input to exercise the two-pass tiled path (min/max reduce + quant).
    key2 = jax.random.PRNGKey(1)
    x_big = jax.random.uniform(key2, (8, 8, 128, 128), dtype=jnp.float32,
                               minval=0.05, maxval=8.0)
    out_big = jax.block_until_ready(quant_log(x_big, bits=8))
    ref_big = _reference(x_big, bits=8)
    assert out_big.shape == x_big.shape and out_big.dtype == x_big.dtype
    assert jnp.allclose(out_big, ref_big, atol=1e-5, rtol=1e-5)

    print("KERNEL_OK")
</pallas_src>

<mosaic_0001>
module attributes {stable_mosaic.version = 11 : i64} {
  func.func @_fused_quant_log_kernel(%arg0: memref<16x128xf32, #tpu.memory_space<vmem>>, %arg1: memref<16x128xf32, #tpu.memory_space<vmem>>) attributes {dimension_semantics = [], scalar_prefetch = 0 : i64, scratch_operands = 0 : i64, tpu.core_type = #tpu.core_type<tc>} {
    %c0 = arith.constant 0 : index
    %c0_0 = arith.constant 0 : index
    %0 = vector.load %arg0[%c0, %c0_0] : memref<16x128xf32, #tpu.memory_space<vmem>>, vector<16x128xf32>
    %1 = math.log %0 : vector<16x128xf32>
    %2 = math.absf %1 : vector<16x128xf32>
    %3 = vector.shape_cast %2 : vector<16x128xf32> to vector<1x16x128xf32>
    %cst = arith.constant dense<0xFF800000> : vector<1xf32>
    %4 = vector.multi_reduction <maximumf>, %3, %cst [1, 2] : vector<1x16x128xf32> to vector<1xf32>
    %5 = vector.shape_cast %4 : vector<1xf32> to vector<1x1x1xf32>
    %6 = vector.extract %5[0, 0, 0] : f32 from vector<1x1x1xf32>
    %cst_1 = arith.constant 0.000000e+00 : f32
    %7 = arith.cmpf ogt, %6, %cst_1 : f32
    %cst_2 = arith.constant 1.270000e+02 : f32
    %8 = arith.divf %6, %cst_2 : f32
    %cst_3 = arith.constant 1.000000e+00 : f32
    %9 = arith.select %7, %8, %cst_3 : f32
    %cst_4 = arith.constant 0.000000e+00 : f32
    %10 = arith.cmpf ogt, %6, %cst_4 : f32
    %cst_5 = arith.constant 1.270000e+02 : f32
    %11 = arith.divf %cst_5, %6 : f32
    %cst_6 = arith.constant 1.000000e+00 : f32
    %12 = arith.select %10, %11, %cst_6 : f32
    %13 = vector.broadcast %12 : f32 to vector<16x128xf32>
    %14 = arith.mulf %1, %13 : vector<16x128xf32>
    %15 = math.roundeven %14 : vector<16x128xf32>
    %cst_7 = arith.constant -1.280000e+02 : f32
    %cst_8 = arith.constant 1.270000e+02 : f32
    %16 = vector.broadcast %cst_7 : f32 to vector<16x128xf32>
    %17 = arith.maximumf %16, %15 : vector<16x128xf32>
    %18 = vector.broadcast %cst_8 : f32 to vector<16x128xf32>
    %19 = arith.minimumf %18, %17 : vector<16x128xf32>
    %20 = vector.broadcast %9 : f32 to vector<16x128xf32>
    %21 = arith.mulf %19, %20 : vector<16x128xf32>
    %c0_9 = arith.constant 0 : index
    %c0_10 = arith.constant 0 : index
    %22 = vector.load %arg1[%c0_9, %c0_10] : memref<16x128xf32, #tpu.memory_space<vmem>>, vector<16x128xf32>
    tpu.vector_store %arg1[%c0_9, %c0_10], %21 {strides = array<i32>} : memref<16x128xf32, #tpu.memory_space<vmem>>, vector<16x128xf32>,
    return
  }
}

</mosaic_0001>

<bundles_post_ra>
// kernel: tpu_custom_call.1
= control target key start
LH: loop header
LB: loop body
LE: loop exit
PB: predicated region body
PF: predicated region fallthrough
CT: control target
= control target key end

     0   :  { %6 = vsyncpa [#allocation3], 0  ;;  %s190_s0 = inlined_call_operand.hbm [shape: f32[16,128], index: 0, kind: input, shape index: {}]   ;;  %s191_s1 = inlined_call_operand.hbm [shape: f32[16,128], index: 1, kind: output, shape index: {}]  }
   0x1   :  { %7 = vsyncpa [#allocation4], 0  ;;  %s146_s6 = smov [#allocation2]   ;;  %s98_s10 = scalar_lea.hbm %s190_s0, 256 }
   0x2   :  { %s13_s7 = sshll.u32 %s146_s6, 4  ;;  %p99_p0 = scmp.ne.s32.totalorder %s190_s0, %s98_s10  ;;  %s14_s7 = int_to_ptr.vmem [resolvable:$true] %s13_s7 }
   0x3   :  { %p102_p1 = scmp.lt.u32.totalorder %s98_s10, %s190_s0 }
   0x5   :  { %p104_p2 = pnand %p102_p1, %p99_p0 }
   0x7   :  { %107 = shalt.err (!%p104_p2)
}
   0x8   :  { %s108_s15 = scalar_lea.vmem %s14_s7, 256  ;;  %p113_p4 = scmp.lt.s32.totalorder %s14_s7, %s14_s7 }
   0x9   :  { %p109_p3 = scmp.ne.s32.totalorder %s14_s7, %s108_s15  ;;  %p114_p5 = scmp.lt.s32.totalorder %s108_s15, %s108_s15 }
   0xb   :  { %p115_p6 = por %p114_p5, %p113_p4 }
   0xd   :  { %p116_p7 = pnand %p115_p6, %p109_p3 }
   0xf   :  { %119 = shalt.err (!%p116_p7)
}
  0x10   :  { %s147_s16 = smov 128   ;;  %s148_s17 = smov 8  }
  0x11   :  { %19 = dma.hbm_to_vmem [thread:$0]  %s190_s0, 256, %s14_s7, [#allocation3], %s147_s16, %s147_s16, %s148_s17  }
  0x12   :  { %142 = dma.done.wait [#allocation3], 256  }
  0x13   :  { %143 = vsyncadd [#allocation3], 4294967040  ;;  %v23_v0 = vld [vmem:[#allocation2] sm:$0xff]  ;;  %v24_v1 = vld [vmem:[#allocation2 + $0x8] sm:$0xff]  ;;  %s149_s23 = smov [#allocation5]  }
  0x14   :  { %92 = vlog2.f32 %v23_v0  ;;  %s70_s24 = sshll.u32 %s149_s23, 4  ;;  %s71_s24 = int_to_ptr.vmem [resolvable:$true] %s70_s24 }
  0x15   :  { %94 = vlog2.f32 %v24_v1  ;;  %s120_s25 = scalar_lea.vmem %s71_s24, 256  ;;  %p125_p10 = scmp.lt.s32.totalorder %s71_s24, %s71_s24 }
  0x16   :  { %p121_p9 = scmp.ne.s32.totalorder %s71_s24, %s120_s25  ;;  %p126_p11 = scmp.lt.s32.totalorder %s120_s25, %s120_s25 }
  0x18   :  { %p127_p12 = por %p126_p11, %p125_p10 }
  0x1a   :  { %p128_p13 = pnand %p127_p12, %p121_p9 }
  0x1e   :  { %v93_v2 = vpop.eup %92 }
  0x1f   :  { %v95_v3 = vpop.eup %94  ;;  %v26_v4 = vmul.f32 0.6931472, %v93_v2 }
  0x20   :  { %v28_v5 = vmul.f32 0.6931472, %v95_v3 }
  0x21   :  { %v29_v6 = vand.u32 2147483647, %v26_v4 }
  0x22   :  { %v30_v7 = vand.u32 2147483647, %v28_v5 }
  0x24   :  { %v31_v8 = vmax.f32.f32 %v29_v6, %v30_v7 }
  0x26   :  { %32 = vmax.xlane.f32.xlu0 %v31_v8 }
  0xb3   :  { %v33_v9 = vpop.xlane.xlu0 %32 }
  0xb4   :  { %v34_v10 = vrot.slane %v33_v9, 4 }
  0xb6   :  { %v35_v11 = vmax.f32 %v33_v9, %v34_v10 }
  0xb8   :  { %v36_v12 = vrot.slane %v35_v11, 2 }
  0xba   :  { %v37_v13 = vmax.f32 %v35_v11, %v36_v12 }
  0xbc   :  { %v38_v14 = vrot.slane %v37_v13, 1 }
  0xbe   :  { %v39_v15 = vmax.f32 %v37_v13, %v38_v14 }
  0xc0   :  { %82 = vpush %v39_v15 }
  0xf1   :  { %s83_s0 = spop %82 }
  0xf2   :  { %v46_v16 = vstv %s83_s0  ;;  %p41_p8 = scmp.gt.f32.partialorder %s83_s0, 0.0  ;;  %s44_s22 = smul.f32 0.007874016, %s83_s0 }
  0xf3   :  { %96 = vrcp.f32 %v46_v16 }
  0xf4   :  { %s195_s22 = smov (!%p41_p8, %s44_s22), 1.0 }
  0xf5   :  { %v60_v27 = vstv %s195_s22 }
  0xfd   :  { %v97_v17 = vpop.eup %96 }
  0xfe   :  { %84 = vpush %v97_v17 }
 0x12f   :  { %s85_s20 = spop %84 }
 0x130   :  { %s49_s21 = smul.f32 127.0, %s85_s20 }
 0x132   :  { %s193_s21 = smov (!%p41_p8, %s49_s21), 1.0 }
 0x133   :  { %v51_v18 = vstv %s193_s21 }
 0x134   :  { %v52_v19 = vmul.f32 %v51_v18, %v26_v4  ;;  %v53_v20 = vmul.f32 %v51_v18, %v28_v5 }
 0x136   :  { %v86_v21 = vround.rtne.f32 %v52_v19  ;;  %v87_v22 = vround.rtne.f32 %v53_v20 }
 0x138   :  { %v56_v23 = vmax.f32 %v86_v21, -128.0  ;;  %v57_v24 = vmax.f32 %v87_v22, -128.0 }
 0x13a   :  { %v58_v25 = vmin.f32 %v56_v23, 127.0  ;;  %v59_v26 = vmin.f32 %v57_v24, 127.0 }
 0x13c   :  { %v61_v28 = vmul.f32 %v60_v27, %v58_v25  ;;  %v62_v29 = vmul.f32 %v60_v27, %v59_v26 }
 0x13e   :  { %63 = vst [vmem:[#allocation5] sm:$0xff] %v61_v28  ;;  %64 = vst [vmem:[#allocation5 + $0x8] sm:$0xff] %v62_v29 }
 0x13f   :  { %131 = shalt.err (!%p128_p13)
}
 0x140   :  { %s132_s28 = scalar_lea.hbm %s191_s1, 256 }
 0x141   :  { %p133_p0 = scmp.ne.s32.totalorder %s191_s1, %s132_s28  ;;  %p136_p1 = scmp.lt.u32.totalorder %s132_s28, %s191_s1 }
 0x143   :  { %p138_p2 = pnand %p136_p1, %p133_p0 }
 0x145   :  { %141 = shalt.err (!%p138_p2)
}
 0x146   :  { %76 = dma.vmem_to_hbm [thread:$0]  %s71_s24, 256, %s191_s1, [#allocation4], %s147_s16, %s147_s16, %s148_s17  }
 0x147   :  { %144 = dma.done.wait [#allocation4], 256  }
 0x148   :  { %145 = vsyncadd [#allocation4], 4294967040 }
 0x149   :  { %80 = vsyncpa [#allocation3], 1 }
 0x14a   :  { %81 = vsyncpa [#allocation4], 1 }

</bundles_post_ra>
